<compile_context>
chip_gen: v5e
topology: v5e:2x2
jax: 0.10.0
libtpu: 0.0.40
codegen_flags: <defaults>
</compile_context>

<pallas_src>
import functools
import math

import jax
import jax.numpy as jnp
from jax.experimental import pallas as pl
from jax.experimental.pallas import tpu as pltpu

_MAX_TIME_TILE = 256  # rows of time per grid step (multiple of 8 = f32 sublane)


def _round_up(x, m):
    return ((x + m - 1) // m) * m


def _pick_time_tile(T):
    """Largest lane/sublane-friendly time tile, capped at _MAX_TIME_TILE."""
    t8 = _round_up(max(T, 8), 8)
    tile = min(t8, _MAX_TIME_TILE)
    Tp = _round_up(t8, tile)
    return tile, Tp


def charrnn_kernel(chars_ref,                    # VMEM (tT, 1) int32
                   rec_ref, wxh_ref, why_ref, by_ref,   # VMEM weights / rec
                   logits_ref, hlast_ref,        # VMEM out
                   *, last_row):
    tT = logits_ref.shape[0]
    Vp = wxh_ref.shape[0]

    # One-hot embedding as a single MXU pass:
    #   onehot(x[t]) @ Wxh, with the one-hot built from a lane-axis iota.
    onehot = (
        chars_ref[...]
        == jax.lax.broadcasted_iota(jnp.int32, (tT, Vp), 1)
    ).astype(jnp.float32)                                     # (tT, Vp)
    x_emb = jnp.dot(onehot, wxh_ref[...],
                    preferred_element_type=jnp.float32)       # (tT, Hp)

    # rec = hprev @ Whh + bh is constant (hprev never updated in the PyTorch
    # loop); it is precomputed once in the wrapper and broadcast here.
    h = jnp.tanh(x_emb + rec_ref[...])                        # (tT, Hp), f32

    logits_ref[...] = (
        jnp.dot(h, why_ref[...], preferred_element_type=jnp.float32)
        + by_ref[...]
    ).astype(logits_ref.dtype)

    # Timestep T-1 lives in the last time tile at static row `last_row`;
    # write h_last exactly once (single writer -> safe for a parallel axis).
    @pl.when(pl.program_id(0) == pl.num_programs(0) - 1)
    def _():
        hlast_ref[...] = h[last_row:last_row + 1, :].astype(hlast_ref.dtype)


def pad_params(wxh, whh, why, bh, by):
    """Pad weights to lane-dense (multiples of 128) layout ONCE, outside jit."""
    V, H = wxh.shape
    Hp = _round_up(H, 128)
    Vp = _round_up(V, 128)
    f32 = jnp.float32
    wxh_p = jnp.zeros((Vp, Hp), f32).at[:V, :H].set(wxh.astype(f32))
    whh_p = jnp.zeros((Hp, Hp), f32).at[:H, :H].set(whh.astype(f32))
    why_p = jnp.zeros((Hp, Vp), f32).at[:H, :V].set(why.astype(f32))
    bh_p = jnp.zeros((1, Hp), f32).at[:, :H].set(bh.reshape(1, -1).astype(f32))
    by_p = jnp.zeros((1, Vp), f32).at[:, :V].set(by.reshape(1, -1).astype(f32))
    return wxh_p, whh_p, why_p, bh_p, by_p


@functools.partial(jax.jit, static_argnames=("vocab_size", "hidden_size"))
def charrnn_forward(hprev, chars, wxh_p, whh_p, why_p, bh_p, by_p,
                    *, vocab_size, hidden_size):
    """CharRNN forward on pre-padded weights.

    Args:
      hprev: (1, H) f32, chars: (T,) int32 char indices (not one-hot),
      *_p:   weights pre-padded by `pad_params`.
    Returns:
      (logits (T, V), h_last (1, H)) — matches the PyTorch forward.
    """
    T = chars.shape[0]
    V, H = vocab_size, hidden_size
    Vp, Hp = wxh_p.shape
    f32 = jnp.float32

    tile, Tp = _pick_time_tile(T)
    num_tiles = Tp // tile
    last_row = (T - 1) - (num_tiles - 1) * tile  # row of timestep T-1 in last tile

    # Per-call (cheap) padding of the dynamic inputs only.
    chars_p = jnp.zeros((Tp, 1), jnp.int32).at[:T, 0].set(chars.astype(jnp.int32))
    hprev_p = jnp.zeros((1, Hp), f32).at[:, :H].set(hprev.astype(f32))

    # Constant recurrent term, computed once (exact f32).
    rec = (
        jnp.dot(hprev_p, whh_p, precision=jax.lax.Precision.HIGHEST,
                preferred_element_type=f32)
        + bh_p
    )                                                           # (1, Hp)

    kernel = functools.partial(charrnn_kernel, last_row=last_row)

    grid_spec = pltpu.PrefetchScalarGridSpec(
        num_scalar_prefetch=0,
        grid=(num_tiles,),
        in_specs=[
            pl.BlockSpec((tile, 1), lambda i: (i, 0)),    # chars (tiled over time)
            pl.BlockSpec((1, Hp), lambda i: (0, 0)),      # rec
            pl.BlockSpec((Vp, Hp), lambda i: (0, 0)),     # Wxh (resident)
            pl.BlockSpec((Hp, Vp), lambda i: (0, 0)),     # Why (resident)
            pl.BlockSpec((1, Vp), lambda i: (0, 0)),      # by
        ],
        out_specs=(
            pl.BlockSpec((tile, Vp), lambda i: (i, 0)),   # logits, tiled over time
            pl.BlockSpec((1, Hp), lambda i: (0, 0)),      # h_last (written once)
        ),
    )

    # Time axis is "parallel": logits tiles are independent and h_last has a
    # single (gated) writer, so v7x can shard tiles across its two TensorCores.
    # TODO(synk): at large H/V, add pl.Buffered(1) on the constant weight specs,
    # tile the vocab axis, and cast matmul inputs to bf16 (v6e/v7x MXU).
    logits_p, hlast_p = pl.pallas_call(
        kernel,
        out_shape=(
            jax.ShapeDtypeStruct((Tp, Vp), jnp.float32),
            jax.ShapeDtypeStruct((1, Hp), jnp.float32),
        ),
        grid_spec=grid_spec,
        compiler_params=pltpu.CompilerParams(dimension_semantics=("parallel",)),
    )(chars_p, rec, wxh_p, why_p, by_p)

    return logits_p[:T, :V], hlast_p[:, :H]


def init_params(key, vocab_size, hidden_size):
    """Deterministic re-implementation of CharRNN.reset_parameters()."""
    stdv = 1.0 / math.sqrt(vocab_size)
    stdv2 = 1.0 / math.sqrt(hidden_size)
    k1, k2, k3 = jax.random.split(key, 3)
    wxh = jax.random.uniform(k1, (vocab_size, hidden_size), jnp.float32, -stdv, stdv)
    whh = jax.random.uniform(k2, (hidden_size, hidden_size), jnp.float32, -stdv2, stdv2)
    why = jax.random.uniform(k3, (hidden_size, vocab_size), jnp.float32, -stdv, stdv)
    bh = jnp.zeros((hidden_size,), jnp.float32)
    by = jnp.zeros((vocab_size,), jnp.float32)
    return wxh, whh, why, bh, by


def reference_forward(hprev, x_onehot, wxh, whh, why, bh, by):
    """Pure-JAX replica of the PyTorch loop for a correctness check."""
    outs = []
    for i in range(x_onehot.shape[0]):
        hs_t = jnp.tanh(x_onehot[i].reshape(1, -1) @ wxh + hprev @ whh + bh)
        outs.append(hs_t)
    output = jnp.concatenate(outs, axis=0)
    logits = output @ why + by
    return logits, output[-1].reshape(1, -1)


if __name__ == "__main__":
    # Pin f32 matmul precision so the pure-JAX reference matches the f32 MXU kernel.
    jax.config.update("jax_default_matmul_precision", "highest")

    vocab_size = 65      # typical char-level vocab
    hidden_size = 100    # matches the PyTorch module default
    seq_len = 16

    key = jax.random.PRNGKey(0)
    kp, kx, kh = jax.random.split(key, 3)

    wxh, whh, why, bh, by = init_params(kp, vocab_size, hidden_size)
    chars = jax.random.randint(kx, (seq_len,), 0, vocab_size, dtype=jnp.int32)
    hprev = jax.random.normal(kh, (1, hidden_size), jnp.float32)

    # Pad weights once, outside the jitted forward.
    wxh_p, whh_p, why_p, bh_p, by_p = pad_params(wxh, whh, why, bh, by)

    logits, h_last = jax.block_until_ready(
        charrnn_forward(hprev, chars, wxh_p, whh_p, why_p, bh_p, by_p,
                        vocab_size=vocab_size, hidden_size=hidden_size)
    )

    x_onehot = jax.nn.one_hot(chars, vocab_size, dtype=jnp.float32)
    ref_logits, ref_h_last = reference_forward(hprev, x_onehot, wxh, whh, why, bh, by)

    assert logits.shape == (seq_len, vocab_size)
    assert h_last.shape == (1, hidden_size)
    assert jnp.allclose(logits, ref_logits, atol=2e-5, rtol=2e-5)
    assert jnp.allclose(h_last, ref_h_last, atol=2e-5, rtol=2e-5)

    print("KERNEL_OK")
</pallas_src>

<mosaic_0001>
module attributes {stable_mosaic.version = 11 : i64} {
  func.func @charrnn_kernel(%arg0: i32, %arg1: memref<16x1xi32, #tpu.memory_space<vmem>>, %arg2: memref<1x128xf32, #tpu.memory_space<vmem>>, %arg3: memref<128x128xf32, #tpu.memory_space<vmem>>, %arg4: memref<128x128xf32, #tpu.memory_space<vmem>>, %arg5: memref<1x128xf32, #tpu.memory_space<vmem>>, %arg6: memref<16x128xf32, #tpu.memory_space<vmem>>, %arg7: memref<1x128xf32, #tpu.memory_space<vmem>>) attributes {dimension_semantics = [#tpu.dimension_semantics<parallel>], iteration_bounds = array<i64: 1>, scalar_prefetch = 0 : i64, scratch_operands = 0 : i64, tpu.core_type = #tpu.core_type<tc>, window_params = [{transform_indices = @transform_0, window_bounds = array<i64: 16, 1>}, {pipeline_mode = #tpu.pipeline_mode<synchronous>, transform_indices = @transform_1, window_bounds = array<i64: 1, 128>}, {pipeline_mode = #tpu.pipeline_mode<synchronous>, transform_indices = @transform_2, window_bounds = array<i64: 128, 128>}, {pipeline_mode = #tpu.pipeline_mode<synchronous>, transform_indices = @transform_3, window_bounds = array<i64: 128, 128>}, {pipeline_mode = #tpu.pipeline_mode<synchronous>, transform_indices = @transform_4, window_bounds = array<i64: 1, 128>}, {transform_indices = @transform_5, window_bounds = array<i64: 16, 128>}, {pipeline_mode = #tpu.pipeline_mode<synchronous>, transform_indices = @transform_6, window_bounds = array<i64: 1, 128>}]} {
    %c0 = arith.constant 0 : index
    %c0_0 = arith.constant 0 : index
    %0 = vector.load %arg1[%c0, %c0_0] : memref<16x1xi32, #tpu.memory_space<vmem>>, vector<16x1xi32>
    %1 = tpu.iota {dimensions = array<i32: 1>} : vector<16x128xi32>
    %2 = vector.broadcast %0 : vector<16x1xi32> to vector<16x128xi32>
    %3 = arith.cmpi eq, %2, %1 : vector<16x128xi32>
    %4 = arith.extui %3 : vector<16x128xi1> to vector<16x128xi32>
    %5 = arith.sitofp %4 : vector<16x128xi32> to vector<16x128xf32>
    %c0_1 = arith.constant 0 : index
    %c0_2 = arith.constant 0 : index
    %6 = vector.load %arg3[%c0_1, %c0_2] : memref<128x128xf32, #tpu.memory_space<vmem>>, vector<128x128xf32>
    %cst = arith.constant dense<0.000000e+00> : vector<16x128xf32>
    %7 = tpu.matmul %5, %6, %cst {dimension_numbers = #tpu.dot_dimension_numbers<[1], [0], [0], [1], [0, 0, 1, 1], [], []>, precision = #tpu.contract_precision<fp32>} : vector<16x128xf32>, vector<128x128xf32>, vector<16x128xf32> -> vector<16x128xf32>
    %c0_3 = arith.constant 0 : index
    %c0_4 = arith.constant 0 : index
    %8 = vector.load %arg2[%c0_3, %c0_4] : memref<1x128xf32, #tpu.memory_space<vmem>>, vector<1x128xf32>
    %9 = vector.broadcast %8 : vector<1x128xf32> to vector<16x128xf32>
    %10 = arith.addf %7, %9 : vector<16x128xf32>
    %11 = math.tanh %10 : vector<16x128xf32>
    %c0_5 = arith.constant 0 : index
    %c0_6 = arith.constant 0 : index
    %12 = vector.load %arg4[%c0_5, %c0_6] : memref<128x128xf32, #tpu.memory_space<vmem>>, vector<128x128xf32>
    %cst_7 = arith.constant dense<0.000000e+00> : vector<16x128xf32>
    %13 = tpu.matmul %11, %12, %cst_7 {dimension_numbers = #tpu.dot_dimension_numbers<[1], [0], [0], [1], [0, 0, 1, 1], [], []>, precision = #tpu.contract_precision<fp32>} : vector<16x128xf32>, vector<128x128xf32>, vector<16x128xf32> -> vector<16x128xf32>
    %c0_8 = arith.constant 0 : index
    %c0_9 = arith.constant 0 : index
    %14 = vector.load %arg5[%c0_8, %c0_9] : memref<1x128xf32, #tpu.memory_space<vmem>>, vector<1x128xf32>
    %15 = vector.broadcast %14 : vector<1x128xf32> to vector<16x128xf32>
    %16 = arith.addf %13, %15 : vector<16x128xf32>
    %c0_10 = arith.constant 0 : index
    %c0_11 = arith.constant 0 : index
    %17 = vector.load %arg6[%c0_10, %c0_11] : memref<16x128xf32, #tpu.memory_space<vmem>>, vector<16x128xf32>
    tpu.vector_store %arg6[%c0_10, %c0_11], %16 {strides = array<i32>} : memref<16x128xf32, #tpu.memory_space<vmem>>, vector<16x128xf32>,
    %c0_i32 = arith.constant 0 : i32
    %18 = arith.cmpi eq, %arg0, %c0_i32 : i32
    %19 = arith.extui %18 : i1 to i32
    %c0_i32_12 = arith.constant 0 : i32
    %20 = arith.cmpi ne, %19, %c0_i32_12 : i32
    scf.if %20 {
      %21 = vector.extract_strided_slice %11 {offsets = [15, 0], sizes = [1, 128], strides = [1, 1]} : vector<16x128xf32> to vector<1x128xf32>
      %c0_13 = arith.constant 0 : index
      %c0_14 = arith.constant 0 : index
      %22 = vector.load %arg7[%c0_13, %c0_14] : memref<1x128xf32, #tpu.memory_space<vmem>>, vector<1x128xf32>
      tpu.vector_store %arg7[%c0_13, %c0_14], %21 {strides = array<i32>} : memref<1x128xf32, #tpu.memory_space<vmem>>, vector<1x128xf32>,
    } else {
    }
    return
  }
  func.func @transform_0(%arg0: i32) -> (i32, i32) {
    %c0_i32 = arith.constant 0 : i32
    %c0_i32_0 = arith.constant 0 : i32
    return %arg0, %c0_i32 : i32, i32
  }
  func.func @transform_1(%arg0: i32) -> (i32, i32) {
    %c0_i32 = arith.constant 0 : i32
    %c0_i32_0 = arith.constant 0 : i32
    %c0_i32_1 = arith.constant 0 : i32
    return %c0_i32, %c0_i32_0 : i32, i32
  }
  func.func @transform_2(%arg0: i32) -> (i32, i32) {
    %c0_i32 = arith.constant 0 : i32
    %c0_i32_0 = arith.constant 0 : i32
    %c0_i32_1 = arith.constant 0 : i32
    return %c0_i32, %c0_i32_0 : i32, i32
  }
  func.func @transform_3(%arg0: i32) -> (i32, i32) {
    %c0_i32 = arith.constant 0 : i32
    %c0_i32_0 = arith.constant 0 : i32
    %c0_i32_1 = arith.constant 0 : i32
    return %c0_i32, %c0_i32_0 : i32, i32
  }
  func.func @transform_4(%arg0: i32) -> (i32, i32) {
    %c0_i32 = arith.constant 0 : i32
    %c0_i32_0 = arith.constant 0 : i32
    %c0_i32_1 = arith.constant 0 : i32
    return %c0_i32, %c0_i32_0 : i32, i32
  }
  func.func @transform_5(%arg0: i32) -> (i32, i32) {
    %c0_i32 = arith.constant 0 : i32
    %c0_i32_0 = arith.constant 0 : i32
    return %arg0, %c0_i32 : i32, i32
  }
  func.func @transform_6(%arg0: i32) -> (i32, i32) {
    %c0_i32 = arith.constant 0 : i32
    %c0_i32_0 = arith.constant 0 : i32
    %c0_i32_1 = arith.constant 0 : i32
    return %c0_i32, %c0_i32_0 : i32, i32
  }
}

</mosaic_0001>

<bundles_post_ra>
// kernel: charrnn_forward.1
= control target key start
LH: loop header
LB: loop body
LE: loop exit
PB: predicated region body
PF: predicated region fallthrough
CT: control target
= control target key end

     0   :  { %12 = vsyncpa [#allocation3], 0  ;;  %s1573_s0 = inlined_call_operand.vmem [shape: s32[16,1], index: 0, kind: input, shape index: {}]   ;;  %s1574_s1 = inlined_call_operand.vmem [shape: f32[1,128], index: 1, kind: input, shape index: {}]   ;;  %s1575_s2 = inlined_call_operand.vmem [shape: f32[128,128], index: 2, kind: input, shape index: {}]   ;;  %s1576_s3 = inlined_call_operand.hbm [shape: f32[128,128], index: 3, kind: input, shape index: {}]   ;;  %s1577_s4 = inlined_call_operand.vmem [shape: f32[1,128], index: 4, kind: input, shape index: {}]   ;;  %s1578_s5 = inlined_call_operand.hbm [shape: f32[16,128], index: 5, kind: output, shape index: {0}]   ;;  %s1579_s6 = inlined_call_operand.hbm [shape: f32[1,128], index: 6, kind: output, shape index: {1}]  }
   0x1   :  { %13 = vsyncpa [#allocation4], 0 }
   0x2   :  { %14 = vsyncpa [#allocation7], 0  ;;  %s25_s23 = sshll.u32 %s1576_s3, 4  ;;  %s985_s24 = smov [#allocation2]   ;;  %s26_s23 = int_to_ptr.hbm [resolvable:$true] %s25_s23 }
   0x3   :  { %s27_s25 = sshll.u32 %s985_s24, 4  ;;  %s986_s26 = smov 128   ;;  %s28_s25 = int_to_ptr.vmem [resolvable:$true] %s27_s25 }
   0x4   :  { %s987_s27 = smov 8  }
   0x5   :  { %33 = dma.hbm_to_vmem [thread:$0]  %s26_s23, 2048, %s28_s25, [#allocation3], %s986_s26, %s986_s26, %s987_s27  }
   0x6   :  { %979 = dma.done.wait [#allocation3], 2048  }
   0x7   :  { %980 = vsyncadd [#allocation3], 4294965248  ;;  %v988_v0 = vmov 0   ;;  %v40_v1 = vld [vmem:[%s1573_s0] sm:$0xff]  ;;  %v71_v2 = vld [vmem:[%s1575_s2 + $0x78] sm:$0xff]  ;;  %s869_s19 = sshll.u32 %s1579_s6, 4  ;;  %s870_s19 = int_to_ptr.hbm [resolvable:$true] %s869_s19 }
   0x8   :  { %900 = vset.pattern.permute.xlu0 %v988_v0  ;;  %v1040_v3 = vand.u32 4294901760, %v71_v2  ;;  %v70_v4 = vld [vmem:[%s1575_s2 + $0x70] sm:$0xff]  ;;  %v69_v5 = vld [vmem:[%s1575_s2 + $0x68] sm:$0xff]  ;;  %v68_v6 = vld [vmem:[%s1575_s2 + $0x60] sm:$0xff]  ;;  %s855_s23 = sshll.u32 %s1578_s5, 4  ;;  %s856_s23 = int_to_ptr.hbm [resolvable:$true] %s855_s23 }
   0x9   :  { %45 = vperm.xlu0 %900, %v40_v1   ;;  %v1051_v7 = vand.u32 4294901760, %v70_v4  ;;  %v1053_v8 = vand.u32 4294901760, %v69_v5  ;;  %v1055_v9 = vand.u32 4294901760, %v68_v6  ;;  %v67_v10 = vld [vmem:[%s1575_s2 + $0x58] sm:$0xff]  ;;  %v66_v11 = vld [vmem:[%s1575_s2 + $0x50] sm:$0xff]  ;;  %v65_v12 = vld [vmem:[%s1575_s2 + $0x48] sm:$0xff] }
   0xa   :  { %v1067_v13 = vsub.f32 %v71_v2, %v1040_v3  ;;  %v1069_v14 = vand.u32 4294901760, %v67_v10  ;;  %77 = vmatpush.msra.mxu0 %v1040_v3  ;;  %v1072_v15 = vand.u32 4294901760, %v66_v11  ;;  %v1074_v16 = vand.u32 4294901760, %v65_v12  ;;  %v64_v17 = vld [vmem:[%s1575_s2 + $0x40] sm:$0xff]  ;;  %290 = vmatpush.msra.mxu3 %v1040_v3  ;;  %v41_v25 = vld [vmem:[%s1573_s0 + $0x8] sm:$0xff]  ;;  %v63_v35 = vld [vmem:[%s1575_s2 + $0x38] sm:$0xff] }
   0xb   :  { %v1081_v18 = vsub.f32 %v70_v4, %v1051_v7  ;;  %v1084_v19 = vsub.f32 %v69_v5, %v1053_v8  ;;  %v1087_v20 = vsub.f32 %v68_v6, %v1055_v9  ;;  %v1089_v21 = vand.u32 4294901760, %v64_v17  ;;  %v62_v39 = vld [vmem:[%s1575_s2 + $0x30] sm:$0xff]  ;;  %v61_v40 = vld [vmem:[%s1575_s2 + $0x28] sm:$0xff]  ;;  %v60_v43 = vld [vmem:[%s1575_s2 + $0x20] sm:$0xff] }
   0xc   :  { %v127_v22 = vand.u32 4294901760, %v1067_v13  ;;  %v1093_v23 = vsub.f32 %v67_v10, %v1069_v14  ;;  %v1096_v24 = vsub.f32 %v66_v11, %v1072_v15  ;;  %79 = vmatpush.msra.mxu0 %v1051_v7  ;;  %232 = vmatpush.msra.mxu2 %v1067_v13  ;;  %v1107_v29 = vsub.f32 %v65_v12, %v1074_v16  ;;  %v59_v50 = vld [vmem:[%s1575_s2 + $0x18] sm:$0xff]  ;;  %v58_v57 = vld [vmem:[%s1575_s2 + $0x10] sm:$0xff]  ;;  %v57_v63 = vld [vmem:[%s1575_s2 + $0x8] sm:$0xff] }
   0xd   :  { %v133_v26 = vand.u32 4294901760, %v1081_v18  ;;  %v139_v27 = vand.u32 4294901760, %v1084_v19  ;;  %v145_v28 = vand.u32 4294901760, %v1087_v20  ;;  %292 = vmatpush.msra.mxu3 %v1051_v7  ;;  %v1123_v34 = vsub.f32 %v64_v17, %v1089_v21  ;;  %v56_v6 = vld [vmem:[%s1575_s2] sm:$0xff] }
   0xe   :  { %v128_v30 = vsub.f32 %v1067_v13, %v127_v22  ;;  %v151_v31 = vand.u32 4294901760, %v1093_v23  ;;  %81 = vmatpush.msra.mxu0 %v1053_v8  ;;  %235 = vmatpush.msra.mxu2 %v1081_v18  ;;  %v157_v38 = vand.u32 4294901760, %v1096_v24  ;;  %v163_v42 = vand.u32 4294901760, %v1107_v29 }
   0xf   :  { %v134_v32 = vsub.f32 %v1081_v18, %v133_v26  ;;  %v140_v33 = vsub.f32 %v1084_v19, %v139_v27  ;;  %294 = vmatpush.msra.mxu3 %v1053_v8  ;;  %v146_v37 = vsub.f32 %v1087_v20, %v145_v28  ;;  %v1149_v46 = vand.u32 4294901760, %v63_v35  ;;  %v464_v18 = vld [vmem:[#allocation2 + $0x70] sm:$0xff] }
  0x10   :  { %v129_v36 = vand.u32 4294901760, %v128_v30  ;;  %83 = vmatpush.msra.mxu0 %v1055_v9  ;;  %238 = vmatpush.msra.mxu2 %v1084_v19  ;;  %v152_v45 = vsub.f32 %v1093_v23, %v151_v31  ;;  %v169_v47 = vand.u32 4294901760, %v1123_v34  ;;  %v1153_v48 = vand.u32 4294901760, %v62_v39  ;;  %v463_v19 = vld [vmem:[#allocation2 + $0x68] sm:$0xff] }
  0x11   :  { %48 = vperm.xlu0 %900, %v41_v25   ;;  %v135_v41 = vand.u32 4294901760, %v134_v32  ;;  %296 = vmatpush.msra.mxu3 %v1055_v9  ;;  %v141_v44 = vand.u32 4294901760, %v140_v33  ;;  %v1155_v49 = vand.u32 4294901760, %v61_v40  ;;  %v147_v51 = vand.u32 4294901760, %v146_v37 }
  0x12   :  { %130 = vmatpush.msra.mxu1 %v129_v36  ;;  %85 = vmatpush.msra.mxu0 %v1069_v14  ;;  %v158_v52 = vsub.f32 %v1096_v24, %v157_v38  ;;  %v1166_v53 = vsub.f32 %v63_v35, %v1149_v46  ;;  %v1169_v54 = vand.u32 4294901760, %v60_v43  ;;  %v164_v55 = vsub.f32 %v1107_v29, %v163_v42 }
  0x13   :  { %241 = vmatpush.msra.mxu2 %v1087_v20  ;;  %298 = vmatpush.msra.mxu3 %v1069_v14  ;;  %v1175_v56 = vsub.f32 %v62_v39, %v1153_v48  ;;  %v153_v58 = vand.u32 4294901760, %v152_v45  ;;  %v1184_v60 = vsub.f32 %v61_v40, %v1155_v49  ;;  %v1187_v61 = vand.u32 4294901760, %v59_v50 }
  0x14   :  { %136 = vmatpush.msra.mxu1 %v135_v41  ;;  %87 = vmatpush.msra.mxu0 %v1072_v15  ;;  %v175_v59 = vand.u32 4294901760, %v1166_v53  ;;  %v170_v62 = vsub.f32 %v1123_v34, %v169_v47  ;;  %v159_v0 = vand.u32 4294901760, %v158_v52  ;;  %v1199_v2 = vsub.f32 %v60_v43, %v1169_v54 }
  0x15   :  { %244 = vmatpush.msra.mxu2 %v1093_v23  ;;  %300 = vmatpush.msra.mxu3 %v1072_v15  ;;  %v181_v1 = vand.u32 4294901760, %v1175_v56  ;;  %v1202_v4 = vand.u32 4294901760, %v58_v57  ;;  %v165_v5 = vand.u32 4294901760, %v164_v55  ;;  %v187_v11 = vand.u32 4294901760, %v1184_v60  ;;  %v462_v23 = vld [vmem:[#allocation2 + $0x60] sm:$0xff] }
  0x16   :  { %142 = vmatpush.msra.mxu1 %v141_v44  ;;  %89 = vmatpush.msra.mxu0 %v1074_v16  ;;  %v176_v10 = vsub.f32 %v1166_v53, %v175_v59  ;;  %v1214_v12 = vsub.f32 %v59_v50, %v1187_v61  ;;  %v1217_v17 = vand.u32 4294901760, %v57_v63  ;;  %v171_v25 = vand.u32 4294901760, %v170_v62 }
  0x17   :  { %247 = vmatpush.msra.mxu2 %v1096_v24  ;;  %302 = vmatpush.msra.mxu3 %v1074_v16  ;;  %v182_v30 = vsub.f32 %v1175_v56, %v181_v1  ;;  %v193_v32 = vand.u32 4294901760, %v1199_v2  ;;  %v1226_v33 = vsub.f32 %v58_v57, %v1202_v4  ;;  %v1229_v35 = vand.u32 4294901760, %v56_v6 }
  0x18   :  { %148 = vmatpush.msra.mxu1 %v147_v51  ;;  %91 = vmatpush.msra.mxu0 %v1089_v21  ;;  %v177_v36 = vand.u32 4294901760, %v176_v10  ;;  %v188_v37 = vsub.f32 %v1184_v60, %v187_v11  ;;  %v199_v39 = vand.u32 4294901760, %v1214_v12  ;;  %v1238_v40 = vsub.f32 %v57_v63, %v1217_v17 }
  0x19   :  { %250 = vmatpush.msra.mxu2 %v1107_v29  ;;  %304 = vmatpush.msra.mxu3 %v1089_v21  ;;  %v183_v41 = vand.u32 4294901760, %v182_v30  ;;  %v194_v43 = vsub.f32 %v1199_v2, %v193_v32  ;;  %v205_v44 = vand.u32 4294901760, %v1226_v33  ;;  %v1248_v45 = vsub.f32 %v56_v6, %v1229_v35  ;;  %v461_v30 = vld [vmem:[#allocation2 + $0x58] sm:$0xff] }
  0x1a   :  { %154 = vmatpush.msra.mxu1 %v153_v58  ;;  %93 = vmatpush.msra.mxu0 %v1149_v46  ;;  %v189_v50 = vand.u32 4294901760, %v188_v37  ;;  %v200_v51 = vsub.f32 %v1214_v12, %v199_v39  ;;  %v211_v52 = vand.u32 4294901760, %v1238_v40  ;;  %v990_v13 = vmov 0.0   ;;  %v459_v37 = vld [vmem:[#allocation2 + $0x48] sm:$0xff] }
  0x1b   :  { %253 = vmatpush.msra.mxu2 %v1123_v34  ;;  %306 = vmatpush.msra.mxu3 %v1149_v46  ;;  %v195_v55 = vand.u32 4294901760, %v194_v43  ;;  %v206_v57 = vsub.f32 %v1226_v33, %v205_v44  ;;  %v217_v58 = vand.u32 4294901760, %v1248_v45  ;;  %v458_v43 = vld [vmem:[#allocation2 + $0x40] sm:$0xff] }
  0x1c   :  { %160 = vmatpush.msra.mxu1 %v159_v0  ;;  %95 = vmatpush.msra.mxu0 %v1153_v48  ;;  %v201_v62 = vand.u32 4294901760, %v200_v51  ;;  %v212_v63 = vsub.f32 %v1238_v40, %v211_v52  ;;  %v1422_v51 = vand.u32 4294901760, %v458_v43 }
  0x1d   :  { %256 = vmatpush.msra.mxu2 %v1166_v53  ;;  %308 = vmatpush.msra.mxu3 %v1153_v48  ;;  %v207_v0 = vand.u32 4294901760, %v206_v57 }
  0x1e   :  { %166 = vmatpush.msra.mxu1 %v165_v5  ;;  %97 = vmatpush.msra.mxu0 %v1155_v49  ;;  %v218_v5 = vsub.f32 %v1248_v45, %v217_v58  ;;  %v213_v6 = vand.u32 4294901760, %v212_v63 }
  0x1f   :  { %259 = vmatpush.msra.mxu2 %v1175_v56  ;;  %310 = vmatpush.msra.mxu3 %v1155_v49 }
  0x20   :  { %172 = vmatpush.msra.mxu1 %v171_v25  ;;  %99 = vmatpush.msra.mxu0 %v1169_v54  ;;  %v219_v10 = vand.u32 4294901760, %v218_v5 }
  0x21   :  { %262 = vmatpush.msra.mxu2 %v1184_v60  ;;  %312 = vmatpush.msra.mxu3 %v1169_v54 }
  0x22   :  { %178 = vmatpush.msra.mxu1 %v177_v36  ;;  %101 = vmatpush.msra.mxu0 %v1187_v61 }
  0x23   :  { %265 = vmatpush.msra.mxu2 %v1199_v2  ;;  %314 = vmatpush.msra.mxu3 %v1187_v61 }
  0x24   :  { %184 = vmatpush.msra.mxu1 %v183_v41  ;;  %103 = vmatpush.msra.mxu0 %v1202_v4  ;;  %v1410_v41 = vand.u32 4294901760, %v459_v37 }
  0x25   :  { %268 = vmatpush.msra.mxu2 %v1214_v12  ;;  %316 = vmatpush.msra.mxu3 %v1202_v4 }
  0x26   :  { %190 = vmatpush.msra.mxu1 %v189_v50  ;;  %105 = vmatpush.msra.mxu0 %v1217_v17  ;;  %v1420_v50 = vsub.f32 %v459_v37, %v1410_v41 }
  0x27   :  { %271 = vmatpush.msra.mxu2 %v1226_v33  ;;  %318 = vmatpush.msra.mxu3 %v1217_v17  ;;  %v460_v33 = vld [vmem:[#allocation2 + $0x50] sm:$0xff] }
  0x28   :  { %196 = vmatpush.msra.mxu1 %v195_v55  ;;  %107 = vmatpush.msra.mxu0 %v1229_v35  ;;  %v1402_v36 = vand.u32 4294901760, %v460_v33 }
  0x29   :  { %274 = vmatpush.msra.mxu2 %v1238_v40  ;;  %320 = vmatpush.msra.mxu3 %v1229_v35 }
  0x2a   :  { %337 = vmatpush.msrb.mxu0 %v127_v22  ;;  %202 = vmatpush.msra.mxu1 %v201_v62  ;;  %v1333_v22 = vand.u32 4294901760, %v463_v19  ;;  %v1408_v40 = vsub.f32 %v460_v33, %v1402_v36  ;;  %v1432_v62 = vsub.f32 %v458_v43, %v1422_v51 }
  0x2b   :  { %277 = vmatpush.msra.mxu2 %v1248_v45 }
  0x2c   :  { %341 = vmatpush.msrb.mxu0 %v133_v26  ;;  %208 = vmatpush.msra.mxu1 %v207_v0  ;;  %v1335_v26 = vand.u32 4294901760, %v462_v23  ;;  %v1344_v29 = vsub.f32 %v463_v19, %v1333_v22  ;;  %v551_v45 = vand.u32 4294901760, %v1408_v40  ;;  %v456_v0 = vld [vmem:[#allocation2 + $0x30] sm:$0xff] }
  0x2e   :  { %345 = vmatpush.msrb.mxu0 %v139_v27  ;;  %214 = vmatpush.msra.mxu1 %v213_v6  ;;  %v1349_v34 = vsub.f32 %v462_v23, %v1335_v26  ;;  %v552_v57 = vsub.f32 %v1408_v40, %v551_v45 }
  0x30   :  { %349 = vmatpush.msrb.mxu0 %v145_v28  ;;  %220 = vmatpush.msra.mxu1 %v219_v10  ;;  %v553_v5 = vand.u32 4294901760, %v552_v57  ;;  %v563_v10 = vand.u32 4294901760, %v1432_v62 }
  0x32   :  { %408 = vmatpush.msrb.mxu1 %v1040_v3  ;;  %353 = vmatpush.msrb.mxu0 %v151_v31  ;;  %v42_v3 = vlaneseq }
  0x34   :  { %410 = vmatpush.msrb.mxu1 %v1051_v7  ;;  %357 = vmatpush.msrb.mxu0 %v157_v38  ;;  %v1316_v7 = vand.u32 127, %v42_v3  ;;  %v1443_v3 = vand.u32 4294901760, %v456_v0 }
  0x36   :  { %412 = vmatpush.msrb.mxu1 %v1053_v8  ;;  %361 = vmatpush.msrb.mxu0 %v163_v42 }
  0x38   :  { %414 = vmatpush.msrb.mxu1 %v1055_v9  ;;  %365 = vmatpush.msrb.mxu0 %v169_v47  ;;  %v989_v9 = vmov 1.0   ;;  %v533_v47 = vand.u32 4294901760, %v1344_v29 }
  0x3a   :  { %416 = vmatpush.msrb.mxu1 %v1069_v14  ;;  %369 = vmatpush.msrb.mxu0 %v175_v59  ;;  %v534_v59 = vsub.f32 %v1344_v29, %v533_v47 }
  0x3c   :  { %418 = vmatpush.msrb.mxu1 %v1072_v15  ;;  %373 = vmatpush.msrb.mxu0 %v181_v1 }
  0x3e   :  { %420 = vmatpush.msrb.mxu1 %v1074_v16  ;;  %377 = vmatpush.msrb.mxu0 %v187_v11  ;;  %v465_v16 = vld [vmem:[#allocation2 + $0x78] sm:$0xff]  ;;  %v535_v11 = vand.u32 4294901760, %v534_v59 }
  0x3f   :  { %v1329_v20 = vand.u32 4294901760, %v465_v16 }
  0x40   :  { %422 = vmatpush.msrb.mxu1 %v1089_v21  ;;  %381 = vmatpush.msrb.mxu0 %v193_v32  ;;  %v1331_v21 = vand.u32 4294901760, %v464_v18  ;;  %v1397_v32 = vand.u32 4294901760, %v461_v30 }
  0x41   :  { %v1338_v27 = vsub.f32 %v465_v16, %v1329_v20  ;;  %471 = vmatpush.msrb.mxu2 %v1329_v20 }
  0x42   :  { %424 = vmatpush.msrb.mxu1 %v1149_v46  ;;  %385 = vmatpush.msrb.mxu0 %v199_v39  ;;  %v1341_v28 = vsub.f32 %v464_v18, %v1331_v21  ;;  %v454_v18 = vld [vmem:[#allocation2 + $0x20] sm:$0xff] }
  0x43   :  { %v521_v42 = vand.u32 4294901760, %v1338_v27  ;;  %473 = vmatpush.msrb.mxu2 %v1331_v21 }
  0x44   :  { %426 = vmatpush.msrb.mxu1 %v1153_v48  ;;  %389 = vmatpush.msrb.mxu0 %v205_v44  ;;  %v527_v46 = vand.u32 4294901760, %v1341_v28 }
  0x45   :  { %475 = vmatpush.msrb.mxu2 %v1333_v22 }
  0x46   :  { %428 = vmatpush.msrb.mxu1 %v1155_v49  ;;  %393 = vmatpush.msrb.mxu0 %v211_v52  ;;  %v539_v49 = vand.u32 4294901760, %v1349_v34  ;;  %v528_v56 = vsub.f32 %v1341_v28, %v527_v46  ;;  %v457_v52 = vld [vmem:[#allocation2 + $0x38] sm:$0xff] }
  0x47   :  { %477 = vmatpush.msrb.mxu2 %v1335_v26  ;;  %v1436_v63 = vand.u32 4294901760, %v457_v52 }
  0x48   :  { %430 = vmatpush.msrb.mxu1 %v1169_v54  ;;  %397 = vmatpush.msrb.mxu0 %v217_v58  ;;  %v522_v54 = vsub.f32 %v1338_v27, %v521_v42  ;;  %v529_v1 = vand.u32 4294901760, %v528_v56  ;;  %v540_v2 = vsub.f32 %v1349_v34, %v539_v49  ;;  %v557_v58 = vand.u32 4294901760, %v1420_v50 }
  0x49   :  { %479 = vmatpush.msrb.mxu2 %v1397_v32 }
  0x4a   :  { %432 = vmatpush.msrb.mxu1 %v1187_v61  ;;  %v523_v61 = vand.u32 4294901760, %v522_v54  ;;  %v558_v6 = vsub.f32 %v1420_v50, %v557_v58 }
  0x4b   :  { %481 = vmatpush.msrb.mxu2 %v1402_v36 }
  0x4c   :  { %434 = vmatpush.msrb.mxu1 %v1202_v4  ;;  %524 = vmatpush.msrb.mxu3 %v523_v61  ;;  %v452_v61 = vld [vmem:[#allocation2 + $0x10] sm:$0xff] }
  0x4d   :  { %483 = vmatpush.msrb.mxu2 %v1410_v41 }
  0x4e   :  { %436 = vmatpush.msrb.mxu1 %v1217_v17  ;;  %530 = vmatpush.msrb.mxu3 %v529_v1  ;;  %v541_v17 = vand.u32 4294901760, %v540_v2 }
  0x4f   :  { %485 = vmatpush.msrb.mxu2 %v1422_v51 }
  0x50   :  { %438 = vmatpush.msrb.mxu1 %v1229_v35  ;;  %536 = vmatpush.msrb.mxu3 %v535_v11  ;;  %v1400_v35 = vsub.f32 %v461_v30, %v1397_v32 }
  0x51   :  { %487 = vmatpush.msrb.mxu2 %v1436_v63 }
  0x52   :  { %542 = vmatpush.msrb.mxu3 %v541_v17  ;;  %v545_v39 = vand.u32 4294901760, %v1400_v35  ;;  %v451_v17 = vld [vmem:[#allocation2 + $0x8] sm:$0xff] }
  0x53   :  { %489 = vmatpush.msrb.mxu2 %v1443_v3  ;;  %v1501_v37 = vand.u32 4294901760, %v451_v17 }
  0x54   :  { %v546_v44 = vsub.f32 %v1400_v35, %v545_v39 }
  0x55   :  { %v604_v57 = vsub.f32 %v451_v17, %v1501_v37 }
  0x56   :  { %v547_v55 = vand.u32 4294901760, %v546_v44  ;;  %v450_v44 = vld [vmem:[#allocation2] sm:$0xff] }
  0x58   :  { %548 = vmatpush.msrb.mxu3 %v547_v55 }
  0x5a   :  { %554 = vmatpush.msrb.mxu3 %v553_v5 }
  0x7b   :  { %v1318_v8 = vpop.permute.xlu0 %45 }
  0x7c   :  { %vm50_vm0 = vcmp.eq.s32.totalorder %v1318_v8, %v1316_v7  ;;  %v455_v8 = vld [vmem:[#allocation2 + $0x28] sm:$0xff] }
  0x7d   :  { %886 = vmatmul.msk.f32.vlgmr.msra.gmra.mxu1 %vm50_vm0, %v989_v9  ;;  %v884_v14 = vsel %vm50_vm0, 1.0, %v990_v13 }
  0x7e   :  { %v109_v15 = vsub.f32 %v884_v14, %v884_v14  ;;  %684 = vmatpush.msra.mxu1 %v1329_v20  ;;  %v1455_v14 = vsub.f32 %v456_v0, %v1443_v3  ;;  %v1509_v0 = vand.u32 4294901760, %v450_v44 }
  0x80   :  { %280 = vmatmul.f32.vlgmr.msra.gmra.mxu2 %v109_v15  ;;  %v110_v24 = vand.u32 4294901760, %v109_v15  ;;  %686 = vmatpush.msra.mxu1 %v1331_v21  ;;  %v575_v23 = vand.u32 4294901760, %v1455_v14 }
  0x82   :  { %324 = vmatmul.f32.vlgmr.msra.gmra.mxu3 %v110_v24  ;;  %v111_v31 = vsub.f32 %v109_v15, %v110_v24  ;;  %688 = vmatpush.msra.mxu1 %v1333_v22  ;;  %v1457_v15 = vand.u32 4294901760, %v455_v8 }
  0x83   :  { %v49_v38 = vpop.permute.xlu0 %48 }
  0x84   :  { %vm51_vm1 = vcmp.eq.s32.totalorder %v49_v38, %v1316_v7  ;;  %v112_v48 = vand.u32 4294901760, %v111_v31  ;;  %690 = vmatpush.msra.mxu1 %v1335_v26  ;;  %v1447_v7 = vsub.f32 %v457_v52, %v1436_v63  ;;  %v1464_v24 = vsub.f32 %v455_v8, %v1457_v15  ;;  %491 = vmatpush.msrb.mxu2 %v1457_v15 }
  0x85   :  { %887 = vmatmul.msk.f32.gmra.mxu1 %vm51_vm1, %v989_v9  ;;  %v885_v53 = vsel %vm51_vm1, 1.0, %v990_v13  ;;  %v564_v13 = vsub.f32 %v1432_v62, %v563_v10  ;;  %v1466_v31 = vand.u32 4294901760, %v454_v18  ;;  %v605_v8 = vand.u32 4294901760, %v604_v57 }
  0x86   :  { %113 = vmatmul.f32.vlgmr.msra.gmra.mxu0 %v112_v48  ;;  %v117_v60 = vsub.f32 %v885_v53, %v885_v53  ;;  %692 = vmatpush.msra.mxu1 %v1397_v32  ;;  %v569_v16 = vand.u32 4294901760, %v1447_v7  ;;  %v453_v48 = vld [vmem:[#allocation2 + $0x18] sm:$0xff]  ;;  %v576_v53 = vsub.f32 %v1455_v14, %v575_v23  ;;  %v581_v54 = vand.u32 4294901760, %v1464_v24 }
  0x87   :  { %626 = vmatpush.msra.mxu0 %v1338_v27  ;;  %v565_v19 = vand.u32 4294901760, %v564_v13  ;;  %v1479_v56 = vsub.f32 %v454_v18, %v1466_v31  ;;  %v1481_v59 = vand.u32 4294901760, %v453_v48  ;;  %493 = vmatpush.msrb.mxu2 %v1466_v31  ;;  %v606_v18 = vsub.f32 %v604_v57, %v605_v8 }
  0x88   :  { %285 = vmatmul.f32.gmra.mxu2 %v117_v60  ;;  %v118_v4 = vand.u32 4294901760, %v117_v60  ;;  %694 = vmatpush.msra.mxu1 %v1402_v36  ;;  %v570_v38 = vsub.f32 %v1447_v7, %v569_v16  ;;  %v577_v1 = vand.u32 4294901760, %v576_v53  ;;  %v582_v2 = vsub.f32 %v1464_v24, %v581_v54 }
  0x89   :  { %629 = vmatpush.msra.mxu0 %v1341_v28  ;;  %v1491_v11 = vsub.f32 %v453_v48, %v1481_v59  ;;  %495 = vmatpush.msrb.mxu2 %v1481_v59  ;;  %v607_v48 = vand.u32 4294901760, %v606_v18 }
  0x8a   :  { %330 = vmatmul.f32.gmra.mxu3 %v118_v4  ;;  %v119_v12 = vsub.f32 %v117_v60, %v118_v4  ;;  %696 = vmatpush.msra.mxu1 %v1410_v41  ;;  %v571_v60 = vand.u32 4294901760, %v570_v38  ;;  %v587_v4 = vand.u32 4294901760, %v1479_v56 }
  0x8b   :  { %632 = vmatpush.msra.mxu0 %v1344_v29  ;;  %v593_v33 = vand.u32 4294901760, %v1491_v11 }
  0x8c   :  { %v120_v25 = vand.u32 4294901760, %v119_v12  ;;  %698 = vmatpush.msra.mxu1 %v1422_v51  ;;  %v1494_v12 = vand.u32 4294901760, %v452_v61  ;;  %v588_v30 = vsub.f32 %v1479_v56, %v587_v4 }
  0x8d   :  { %890 = vmatmul.msk.f32.vlgmr.msrb.gmra.mxu1 %vm50_vm0, %v989_v9  ;;  %635 = vmatpush.msra.mxu0 %v1349_v34  ;;  %v594_v55 = vsub.f32 %v1491_v11, %v593_v33 }
  0x8e   :  { %121 = vmatmul.f32.gmra.mxu0 %v120_v25  ;;  %700 = vmatpush.msra.mxu1 %v1436_v63  ;;  %v583_v25 = vand.u32 4294901760, %v582_v2  ;;  %v598_v43 = vsub.f32 %v452_v61, %v1494_v12  ;;  %v589_v52 = vand.u32 4294901760, %v588_v30  ;;  %v902_v2 = vld [vmem:[%s1577_s4] ss:$0 sm:$0xff]  ;;  %s992_s4 = smov [#allocation5]  }
  0x8f   :  { %638 = vmatpush.msra.mxu0 %v1400_v35  ;;  %497 = vmatpush.msrb.mxu2 %v1494_v12  ;;  %s853_s6 = sshll.u32 %s992_s4, 4  ;;  %s854_s6 = int_to_ptr.vmem [resolvable:$true] %s853_s6 }
  0x90   :  { %702 = vmatpush.msra.mxu1 %v1443_v3  ;;  %v599_v5 = vand.u32 4294901760, %v598_v43 }
  0x91   :  { %641 = vmatpush.msra.mxu0 %v1408_v40  ;;  %499 = vmatpush.msrb.mxu2 %v1501_v37 }
  0x92   :  { %704 = vmatpush.msra.mxu1 %v1457_v15  ;;  %v600_v13 = vsub.f32 %v598_v43, %v599_v5 }
  0x93   :  { %644 = vmatpush.msra.mxu0 %v1420_v50  ;;  %501 = vmatpush.msrb.mxu2 %v1509_v0 }
  0x94   :  { %706 = vmatpush.msra.mxu1 %v1466_v31  ;;  %v601_v38 = vand.u32 4294901760, %v600_v13 }
  0x95   :  { %891 = vmatmul.msk.f32.gmra.mxu1 %vm51_vm1, %v989_v9  ;;  %647 = vmatpush.msra.mxu0 %v1432_v62 }
  0x96   :  { %888 = vmatmul.msk.f32.vlgmr.msrb.gmra.mxu0 %vm50_vm0, %v989_v9  ;;  %708 = vmatpush.msra.mxu1 %v1481_v59 }
  0x97   :  { %650 = vmatpush.msra.mxu0 %v1447_v7  ;;  %731 = vmatpush.msra.mxu2 %v521_v42 }
  0x98   :  { %710 = vmatpush.msra.mxu1 %v1494_v12 }
  0x99   :  { %653 = vmatpush.msra.mxu0 %v1455_v14  ;;  %735 = vmatpush.msra.mxu2 %v527_v46 }
  0x9a   :  { %712 = vmatpush.msra.mxu1 %v1501_v37 }
  0x9b   :  { %656 = vmatpush.msra.mxu0 %v1464_v24  ;;  %739 = vmatpush.msra.mxu2 %v533_v47 }
  0x9c   :  { %714 = vmatpush.msra.mxu1 %v1509_v0 }
  0x9d   :  { %659 = vmatpush.msra.mxu0 %v1479_v56  ;;  %743 = vmatpush.msra.mxu2 %v539_v49 }
  0x9e   :  { %889 = vmatmul.msk.f32.gmra.mxu0 %vm51_vm1, %v989_v9  ;;  %v559_v9 = vand.u32 4294901760, %v558_v6  ;;  %v595_v6 = vand.u32 4294901760, %v594_v55 }
  0x9f   :  { %662 = vmatpush.msra.mxu0 %v1491_v11  ;;  %747 = vmatpush.msra.mxu2 %v545_v39 }
  0xa0   :  { %560 = vmatpush.msrb.mxu3 %v559_v9  ;;  %v610_v9 = vsub.f32 %v450_v44, %v1509_v0 }
  0xa1   :  { %665 = vmatpush.msra.mxu0 %v598_v43  ;;  %751 = vmatpush.msra.mxu2 %v551_v45 }
  0xa2   :  { %566 = vmatpush.msrb.mxu3 %v565_v19  ;;  %v611_v19 = vand.u32 4294901760, %v610_v9 }
  0xa3   :  { %668 = vmatpush.msra.mxu0 %v604_v57  ;;  %755 = vmatpush.msra.mxu2 %v557_v58 }
  0xa4   :  { %572 = vmatpush.msrb.mxu3 %v571_v60  ;;  %v612_v53 = vsub.f32 %v610_v9, %v611_v19 }
  0xa5   :  { %671 = vmatpush.msra.mxu0 %v610_v9  ;;  %759 = vmatpush.msra.mxu2 %v563_v10 }
  0xa6   :  { %578 = vmatpush.msrb.mxu3 %v577_v1  ;;  %v613_v60 = vand.u32 4294901760, %v612_v53 }
  0xa7   :  { %763 = vmatpush.msra.mxu2 %v569_v16 }
  0xa8   :  { %584 = vmatpush.msrb.mxu3 %v583_v25 }
  0xa9   :  { %767 = vmatpush.msra.mxu2 %v575_v23 }
  0xaa   :  { %590 = vmatpush.msrb.mxu3 %v589_v52 }
  0xab   :  { %771 = vmatpush.msra.mxu2 %v581_v54 }
  0xac   :  { %596 = vmatpush.msrb.mxu3 %v595_v6 }
  0xad   :  { %775 = vmatpush.msra.mxu2 %v587_v4 }
  0xae   :  { %602 = vmatpush.msrb.mxu3 %v601_v38 }
  0xaf   :  { %779 = vmatpush.msra.mxu2 %v593_v33 }
  0xb0   :  { %608 = vmatpush.msrb.mxu3 %v607_v48 }
  0xb1   :  { %783 = vmatpush.msra.mxu2 %v599_v5 }
  0xb2   :  { %614 = vmatpush.msrb.mxu3 %v613_v60 }
  0xb3   :  { %787 = vmatpush.msra.mxu2 %v605_v8 }
  0xb4   :  { %802 = vmatpush.msra.mxu3 %v1329_v20 }
  0xb5   :  { %791 = vmatpush.msra.mxu2 %v611_v19 }
  0xb6   :  { %804 = vmatpush.msra.mxu3 %v1331_v21  ;;  %v901_v21 = vld [vmem:[%s1574_s1] ss:$0 sm:$0xff]  ;;  %s991_s1 = smov [#allocation6]  }
  0xb7   :  { %s867_s16 = sshll.u32 %s991_s1, 4  ;;  %s868_s16 = int_to_ptr.vmem [resolvable:$true] %s867_s16 }
  0xb8   :  { %806 = vmatpush.msra.mxu3 %v1333_v22 }
  0xba   :  { %808 = vmatpush.msra.mxu3 %v1335_v26 }
  0xbc   :  { %810 = vmatpush.msra.mxu3 %v1397_v32 }
  0xbe   :  { %812 = vmatpush.msra.mxu3 %v1402_v36 }
  0xc0   :  { %814 = vmatpush.msra.mxu3 %v1410_v41 }
  0xc2   :  { %816 = vmatpush.msra.mxu3 %v1422_v51 }
  0xc4   :  { %818 = vmatpush.msra.mxu3 %v1436_v63 }
  0xc6   :  { %820 = vmatpush.msra.mxu3 %v1443_v3 }
  0xc8   :  { %822 = vmatpush.msra.mxu3 %v1457_v15 }
  0xca   :  { %824 = vmatpush.msra.mxu3 %v1466_v31 }
  0xcc   :  { %826 = vmatpush.msra.mxu3 %v1481_v59 }
  0xce   :  { %828 = vmatpush.msra.mxu3 %v1494_v12 }
  0xd0   :  { %830 = vmatpush.msra.mxu3 %v1501_v37 }
  0xd2   :  { %832 = vmatpush.msra.mxu3 %v1509_v0 }
  0xfa   :  { %v223_v20 = vpop.f32.mrf.mxu1 }
 0x102   :  { %v227_v27 = vpop.f32.mrf.mxu1 }
 0x103   :  { %v114_v22 = vpop.f32.mrf.mxu0  ;;  %v281_v29 = vpop.f32.mrf.mxu2 }
 0x104   :  { %v115_v26 = vadd.f32 %v901_v21, %v114_v22 }
 0x105   :  { %v325_v47 = vpop.f32.mrf.mxu3 }
 0x106   :  { %v224_v28 = vadd.f32 %v223_v20, %v115_v26 }
 0x108   :  { %v282_v42 = vadd.f32 %v281_v29, %v224_v28 }
 0x10a   :  { %v326_v49 = vadd.f32 %v325_v47, %v282_v42  ;;  %v441_v35 = vpop.f32.mrf.mxu1 }
 0x10b   :  { %v122_v34 = vpop.f32.mrf.mxu0  ;;  %v286_v40 = vpop.f32.mrf.mxu2 }
 0x10c   :  { %v123_v46 = vadd.f32 %v901_v21, %v122_v34 }
 0x10d   :  { %v331_v50 = vpop.f32.mrf.mxu3 }
 0x10e   :  { %v228_v32 = vadd.f32 %v227_v27, %v123_v46 }
 0x110   :  { %v287_v41 = vadd.f32 %v286_v40, %v228_v32 }
 0x112   :  { %v332_v51 = vadd.f32 %v331_v50, %v287_v41  ;;  %v445_v63 = vpop.f32.mrf.mxu1 }
 0x113   :  { %v400_v36 = vpop.f32.mrf.mxu0 }
 0x114   :  { %v401_v39 = vadd.f32 %v400_v36, %v326_v49 }
 0x116   :  { %v442_v45 = vadd.f32 %v441_v35, %v401_v39 }
 0x118   :  { %903 = vtanh.f32 %v442_v45 }
 0x11b   :  { %v404_v58 = vpop.f32.mrf.mxu0 }
 0x11c   :  { %v405_v62 = vadd.f32 %v404_v58, %v332_v51 }
 0x11e   :  { %v904_v10 = vpop.eup %903  ;;  %v446_v3 = vadd.f32 %v445_v63, %v405_v62 }
 0x11f   :  { %v502_v7 = vand.u32 4294901760, %v904_v10 }
 0x120   :  { %905 = vtanh.f32 %v446_v3 }
 0x121   :  { %616 = vmatmul.f32.vlgmr.msrb.gmra.mxu3 %v502_v7  ;;  %v503_v14 = vsub.f32 %v904_v10, %v502_v7 }
 0x123   :  { %674 = vmatmul.f32.vlgmr.msra.gmra.mxu0 %v503_v14  ;;  %v504_v15 = vand.u32 4294901760, %v503_v14 }
 0x125   :  { %718 = vmatmul.f32.vlgmr.msra.gmra.mxu1 %v504_v15  ;;  %v505_v16 = vsub.f32 %v503_v14, %v504_v15 }
 0x126   :  { %v906_v23 = vpop.eup %905 }
 0x127   :  { %848 = vst [vmem:[#allocation6 - $0x7] sm:$0x80] %v906_v23  ;;  %v506_v24 = vand.u32 4294901760, %v505_v16  ;;  %v510_v31 = vand.u32 4294901760, %v906_v23 }
 0x128   :  { %872 = dma.vmem_to_hbm [thread:$0]  %s868_s16, 16, %s870_s19, [#allocation7]  }
 0x129   :  { %507 = vmatmul.f32.vlgmr.msrb.gmra.mxu2 %v506_v24  ;;  %620 = vmatmul.f32.gmra.mxu3 %v510_v31  ;;  %v511_v54 = vsub.f32 %v906_v23, %v510_v31 }
 0x12b   :  { %679 = vmatmul.f32.gmra.mxu0 %v511_v54  ;;  %v512_v56 = vand.u32 4294901760, %v511_v54 }
 0x12d   :  { %724 = vmatmul.f32.gmra.mxu1 %v512_v56  ;;  %v513_v59 = vsub.f32 %v511_v54, %v512_v56 }
 0x12f   :  { %v514_v61 = vand.u32 4294901760, %v513_v59 }
 0x131   :  { %515 = vmatmul.f32.gmra.mxu2 %v514_v61  ;;  %834 = vmatmul.f32.vlgmr.msra.gmra.mxu3 %v502_v7 }
 0x139   :  { %793 = vmatmul.f32.vlgmr.msra.gmra.mxu2 %v502_v7  ;;  %838 = vmatmul.f32.gmra.mxu3 %v510_v31 }
 0x141   :  { %797 = vmatmul.f32.gmra.mxu2 %v510_v31 }
 0x1a0   :  { %v675_v25 = vpop.f32.mrf.mxu0 }
 0x1a2   :  { %v719_v43 = vpop.f32.mrf.mxu1 }
 0x1a4   :  { %v617_v1 = vpop.f32.mrf.mxu3 }
 0x1a8   :  { %v680_v5 = vpop.f32.mrf.mxu0 }
 0x1aa   :  { %v725_v9 = vpop.f32.mrf.mxu1 }
 0x1ac   :  { %v508_v4 = vpop.f32.mrf.mxu2  ;;  %v621_v12 = vpop.f32.mrf.mxu3 }
 0x1ad   :  { %v509_v11 = vadd.f32 %v902_v2, %v508_v4 }
 0x1af   :  { %v618_v17 = vadd.f32 %v617_v1, %v509_v11 }
 0x1b1   :  { %v676_v37 = vadd.f32 %v675_v25, %v618_v17 }
 0x1b3   :  { %v720_v52 = vadd.f32 %v719_v43, %v676_v37 }
 0x1b4   :  { %v516_v30 = vpop.f32.mrf.mxu2  ;;  %v835_v55 = vpop.f32.mrf.mxu3 }
 0x1b5   :  { %v517_v33 = vadd.f32 %v902_v2, %v516_v30 }
 0x1b7   :  { %v622_v44 = vadd.f32 %v621_v12, %v517_v33 }
 0x1b9   :  { %v681_v8 = vadd.f32 %v680_v5, %v622_v44 }
 0x1bb   :  { %v726_v13 = vadd.f32 %v725_v9, %v681_v8 }
 0x1bc   :  { %v794_v57 = vpop.f32.mrf.mxu2  ;;  %v839_v38 = vpop.f32.mrf.mxu3 }
 0x1bd   :  { %v795_v0 = vadd.f32 %v794_v57, %v720_v52 }
 0x1bf   :  { %v836_v6 = vadd.f32 %v835_v55, %v795_v0 }
 0x1c1   :  { %842 = vst [vmem:[#allocation5] sm:$0xff] %v836_v6 }
 0x1c4   :  { %v798_v18 = vpop.f32.mrf.mxu2 }
 0x1c5   :  { %v799_v19 = vadd.f32 %v798_v18, %v726_v13 }
 0x1c7   :  { %v840_v48 = vadd.f32 %v839_v38, %v799_v19 }
 0x1c9   :  { %843 = vst [vmem:[#allocation5 + $0x8] sm:$0xff] %v840_v48 }
 0x1ca   :  { %861 = dma.vmem_to_hbm [thread:$0]  %s854_s6, 256, %s856_s23, [#allocation4], %s986_s26, %s986_s26, %s987_s27  }
 0x1cb   :  { %981 = dma.done.wait [#allocation4], 256  }
 0x1cc   :  { %982 = vsyncadd [#allocation4], 4294967040 }
 0x1cd   :  { %983 = dma.done.wait [#allocation7], 16  }
 0x1ce   :  { %984 = vsyncadd [#allocation7], 4294967280 }
 0x1cf   :  { %881 = vsyncpa [#allocation3], 1 }
 0x1d0   :  { %882 = vsyncpa [#allocation4], 1 }
 0x1d1   :  { %883 = vsyncpa [#allocation7], 1 }

</bundles_post_ra>
